<compile_context>
chip_gen: v7x
topology: tpu7x:2x2x1
jax: 0.10.0
libtpu: 0.0.40
codegen_flags: <defaults>
</compile_context>

<pallas_src>
import functools

import jax
import jax.numpy as jnp
from jax.experimental import pallas as pl
from jax.experimental.pallas import tpu as pltpu

DEFAULT_EPS = 1e-5


def _ada_ln_kernel(x_ref, emb_ref, gamma_ref, beta_ref, o_ref, *,
                   eps, low_precision_mod):
    # x_ref:     (1, tS, D)   current (batch, seq-tile)
    # emb_ref:   (1, 2, D)    row 0 = shift, row 1 = scale (per batch)
    # gamma_ref: (1, D)       LayerNorm weight (shared)
    # beta_ref:  (1, D)       LayerNorm bias   (shared)
    # o_ref:     (1, tS, D)
    x = x_ref[0].astype(jnp.float32)                       # (tS, D)

    shift = emb_ref[0, 0:1, :].astype(jnp.float32)         # (1, D)
    scale = emb_ref[0, 1:2, :].astype(jnp.float32)         # (1, D)
    gamma = gamma_ref[...].astype(jnp.float32)             # (1, D)
    beta = beta_ref[...].astype(jnp.float32)               # (1, D)

    # Fold LayerNorm affine + AdaLN modulation into one per-lane scale/offset:
    #   normed*gamma*(1+scale) + beta*(1+scale) + shift == (xc*inv)*g + b
    one_plus_scale = 1.0 + scale
    g = gamma * one_plus_scale                              # (1, D)
    b = beta * one_plus_scale + shift                       # (1, D)

    # Single-pass row statistics (biased variance, PyTorch convention).
    inv_d = jnp.float32(1.0 / x.shape[-1])
    mean = jnp.sum(x, axis=-1, keepdims=True) * inv_d       # (tS, 1)
    mean_sq = jnp.sum(x * x, axis=-1, keepdims=True) * inv_d
    var = jnp.maximum(mean_sq - mean * mean, 0.0)           # cancellation guard
    inv = jax.lax.rsqrt(var + eps)

    normed = (x - mean) * inv                                # (tS, D), f32

    if low_precision_mod:
        # bf16 VPU path (v6e/v7x, bf16 inputs): modulate in the output dtype.
        out_dt = o_ref.dtype
        o_ref[0] = normed.astype(out_dt) * g.astype(out_dt) + b.astype(out_dt)
    else:
        o_ref[0] = (normed * g + b).astype(o_ref.dtype)


def _chip_profile():
    """Return (scoped_vmem_cap_bytes, num_tensorcores, has_bf16_vpu)."""
    kind = ""
    try:
        kind = jax.devices()[0].device_kind.lower()
    except Exception:  # pragma: no cover - defensive; default profile below
        pass
    if "7" in kind:
        # v7x: 64 MiB VMEM per TC, 2 TCs/chip, bf16 VPU.
        return 48 << 20, 2, True
    if "v5 lite" in kind or "v5e" in kind or "v5lite" in kind:
        # v5e: 128 MiB VMEM, 1 TC, no bf16 VPU.
        return 96 << 20, 1, False
    if "v4" in kind or "v5p" in kind or kind.strip().endswith("v5"):
        # v4/v5p: 128 MiB VMEM, 2 TCs (megacore), keep f32 compute path.
        return 96 << 20, 2, False
    # v6e (and unknown) default: 128 MiB VMEM, 1 TC, bf16 VPU.
    return 96 << 20, 1, True


def _pick_block_s(S, D, itemsize, vmem_cap):
    """Largest sublane-aligned seq tile whose VMEM footprint fits the budget.

    Footprint per row: 2x double-buffered (in + out) rows in x.dtype plus ~3
    full-width f32 temporaries materialized by the kernel body.
    """
    bytes_per_row = D * (2 * 2 * itemsize + 3 * 4)
    budget = max(vmem_cap - (4 << 20), bytes_per_row * 8)
    budget_rows = max(8, budget // bytes_per_row)
    max_rows = int(min(1024, budget_rows))   # >1024 rows: diminishing returns
    if S <= max_rows:
        return S                             # whole sequence in one tile
    cands = [c for c in (1024, 768, 512, 384, 256, 192, 128, 96, 64, 32, 16, 8)
             if c <= max_rows]
    if not cands:
        return 8
    best = cands[0]                          # largest fitting tile (ragged tail OK)
    for c in cands:
        if 2 * c >= best and S % c == 0:
            return c                         # exact divisor near best: no ragged tile
    return best


def _ensure_min_steps(B, S, block_s, min_steps):
    """Shrink the seq tile (keeping sublane alignment) until the grid has at
    least `min_steps` iterations, so 2-TC chips (v7x/v4/v5p) get balanced work."""
    def steps(bs):
        return B * ((S + bs - 1) // bs)
    while steps(block_s) < min_steps and block_s > 8 and block_s % 16 == 0:
        block_s //= 2
    return block_s


def chroma_ada_layernorm_continuous_pruned(x, emb, gamma, beta,
                                           *, eps=DEFAULT_EPS, block_s=None):
    """x: (B, S, D) ; emb: (B, 2, D) ; gamma, beta: (D,)"""
    B, S, D = x.shape
    assert emb.shape == (B, 2, D), emb.shape
    gamma2d = jnp.asarray(gamma).reshape(1, D)
    beta2d = jnp.asarray(beta).reshape(1, D)
    # NOTE: D stays whole on the lane axis. Lane-dense (unmasked) stores need
    # D % 128 == 0 (Chroma's D=3072 qualifies); other D remains correct but
    # writes back through masked stores.

    vmem_cap, num_tc, bf16_vpu = _chip_profile()
    itemsize = jnp.dtype(x.dtype).itemsize

    if block_s is None:
        block_s = _pick_block_s(S, D, itemsize, vmem_cap)
    if num_tc >= 2:
        block_s = _ensure_min_steps(B, S, block_s, min_steps=2 * num_tc)
    grid = (B, pl.cdiv(S, block_s))

    # Scoped-VMEM budget that matches what the kernel actually touches:
    # double-buffered I/O tiles in x.dtype + ~3 full-tile f32 temporaries
    # (x upcast, x*x, pre-store product) + the small per-batch slabs + margin.
    io_bytes = 2 * 2 * block_s * D * itemsize
    f32_tmp_bytes = 3 * block_s * D * 4
    small_bytes = 6 * D * 4 + (1 << 20)
    needed = io_bytes + f32_tmp_bytes + small_bytes
    vmem_limit = int(min(max(needed, 32 << 20), vmem_cap))

    low_precision_mod = bool(bf16_vpu
                             and jnp.dtype(x.dtype) == jnp.dtype(jnp.bfloat16))
    kernel = functools.partial(_ada_ln_kernel, eps=eps,
                               low_precision_mod=low_precision_mod)

    return pl.pallas_call(
        kernel,
        out_shape=jax.ShapeDtypeStruct((B, S, D), x.dtype),
        grid_spec=pltpu.PrefetchScalarGridSpec(
            num_scalar_prefetch=0,
            grid=grid,
            in_specs=[
                pl.BlockSpec((1, block_s, D), lambda b, s: (b, s, 0)),  # x tile
                pl.BlockSpec((1, 2, D), lambda b, s: (b, 0, 0)),        # emb per batch
                pl.BlockSpec((1, D), lambda b, s: (0, 0)),              # gamma (shared)
                pl.BlockSpec((1, D), lambda b, s: (0, 0)),              # beta (shared)
            ],
            out_specs=pl.BlockSpec((1, block_s, D), lambda b, s: (b, s, 0)),
        ),
        compiler_params=pltpu.CompilerParams(
            dimension_semantics=("parallel", "parallel"),
            vmem_limit_bytes=vmem_limit,
        ),
    )(x, emb, gamma2d, beta2d)


def _reference(x, emb, gamma, beta, eps=DEFAULT_EPS):
    # Pure-JAX reference mirroring the PyTorch forward:
    #   shift, scale = chunk(emb.flatten(1,2).to(x.dtype), 2, dim=1)
    shift = emb[:, 0, :].astype(x.dtype)
    scale = emb[:, 1, :].astype(x.dtype)
    xf = x.astype(jnp.float32)
    mean = jnp.mean(xf, axis=-1, keepdims=True)
    var = jnp.mean((xf - mean) ** 2, axis=-1, keepdims=True)
    normed = (xf - mean) * jax.lax.rsqrt(var + eps) * gamma + beta
    out = normed * (1.0 + scale)[:, None, :] + shift[:, None, :]
    return out.astype(x.dtype)


if __name__ == "__main__":
    B, S, D = 2, 16, 128  # batch, sequence length, embedding_dim (small smoke test)

    key = jax.random.PRNGKey(0)
    kx, ke, kg, kb = jax.random.split(key, 4)

    x = jax.random.normal(kx, (B, S, D), dtype=jnp.float32)
    emb = jax.random.normal(ke, (B, 2, D), dtype=jnp.float32)

    # Deterministic synthetic LayerNorm affine params (elementwise_affine=True, bias=True).
    gamma = 1.0 + 0.1 * jax.random.normal(kg, (D,), dtype=jnp.float32)
    beta = 0.1 * jax.random.normal(kb, (D,), dtype=jnp.float32)

    out = chroma_ada_layernorm_continuous_pruned(x, emb, gamma, beta)
    out = jax.block_until_ready(out)

    ref = _reference(x, emb, gamma, beta)
    assert out.shape == (B, S, D)
    assert jnp.allclose(out, ref, atol=1e-5, rtol=1e-5), "mismatch vs reference"

    print("KERNEL_OK")
</pallas_src>

<mosaic_0001>
module attributes {stable_mosaic.version = 11 : i64} {
  func.func @_ada_ln_kernel(%arg0: i32, %arg1: i32, %arg2: memref<1x16x128xf32, #tpu.memory_space<vmem>>, %arg3: memref<1x2x128xf32, #tpu.memory_space<vmem>>, %arg4: memref<1x128xf32, #tpu.memory_space<vmem>>, %arg5: memref<1x128xf32, #tpu.memory_space<vmem>>, %arg6: memref<1x16x128xf32, #tpu.memory_space<vmem>>) attributes {dimension_semantics = [#tpu.dimension_semantics<parallel>, #tpu.dimension_semantics<parallel>], iteration_bounds = array<i64: 2, 1>, scalar_prefetch = 0 : i64, scratch_operands = 0 : i64, tpu.core_type = #tpu.core_type<tc>, window_params = [{transform_indices = @transform_0, window_bounds = array<i64: 1, 16, 128>}, {transform_indices = @transform_1, window_bounds = array<i64: 1, 2, 128>}, {pipeline_mode = #tpu.pipeline_mode<synchronous>, transform_indices = @transform_2, window_bounds = array<i64: 1, 128>}, {pipeline_mode = #tpu.pipeline_mode<synchronous>, transform_indices = @transform_3, window_bounds = array<i64: 1, 128>}, {transform_indices = @transform_4, window_bounds = array<i64: 1, 16, 128>}]} {
    %c0 = arith.constant 0 : index
    %c0_0 = arith.constant 0 : index
    %c0_1 = arith.constant 0 : index
    %0 = vector.load %arg2[%c0, %c0_0, %c0_1] : memref<1x16x128xf32, #tpu.memory_space<vmem>>, vector<1x16x128xf32>
    %1 = vector.shape_cast %0 : vector<1x16x128xf32> to vector<16x128xf32>
    %c0_2 = arith.constant 0 : index
    %c0_3 = arith.constant 0 : index
    %c0_4 = arith.constant 0 : index
    %2 = vector.load %arg3[%c0_2, %c0_3, %c0_4] : memref<1x2x128xf32, #tpu.memory_space<vmem>>, vector<1x1x128xf32>
    %3 = vector.shape_cast %2 : vector<1x1x128xf32> to vector<1x128xf32>
    %c0_5 = arith.constant 0 : index
    %c1 = arith.constant 1 : index
    %c0_6 = arith.constant 0 : index
    %4 = vector.load %arg3[%c0_5, %c1, %c0_6] : memref<1x2x128xf32, #tpu.memory_space<vmem>>, vector<1x1x128xf32>
    %5 = vector.shape_cast %4 : vector<1x1x128xf32> to vector<1x128xf32>
    %c0_7 = arith.constant 0 : index
    %c0_8 = arith.constant 0 : index
    %6 = vector.load %arg4[%c0_7, %c0_8] : memref<1x128xf32, #tpu.memory_space<vmem>>, vector<1x128xf32>
    %c0_9 = arith.constant 0 : index
    %c0_10 = arith.constant 0 : index
    %7 = vector.load %arg5[%c0_9, %c0_10] : memref<1x128xf32, #tpu.memory_space<vmem>>, vector<1x128xf32>
    %cst = arith.constant 1.000000e+00 : f32
    %8 = vector.broadcast %cst : f32 to vector<1x128xf32>
    %9 = arith.addf %8, %5 : vector<1x128xf32>
    %10 = arith.mulf %6, %9 : vector<1x128xf32>
    %11 = arith.mulf %7, %9 : vector<1x128xf32>
    %12 = arith.addf %11, %3 : vector<1x128xf32>
    %cst_11 = arith.constant dense<0.000000e+00> : vector<16xf32>
    %13 = vector.multi_reduction <add>, %1, %cst_11 [1] : vector<16x128xf32> to vector<16xf32>
    %14 = vector.shape_cast %13 : vector<16xf32> to vector<16x1xf32>
    %cst_12 = arith.constant 7.812500e-03 : f32
    %15 = vector.broadcast %cst_12 : f32 to vector<16x1xf32>
    %16 = arith.mulf %14, %15 : vector<16x1xf32>
    %17 = arith.mulf %1, %1 : vector<16x128xf32>
    %cst_13 = arith.constant dense<0.000000e+00> : vector<16xf32>
    %18 = vector.multi_reduction <add>, %17, %cst_13 [1] : vector<16x128xf32> to vector<16xf32>
    %19 = vector.shape_cast %18 : vector<16xf32> to vector<16x1xf32>
    %cst_14 = arith.constant 7.812500e-03 : f32
    %20 = vector.broadcast %cst_14 : f32 to vector<16x1xf32>
    %21 = arith.mulf %19, %20 : vector<16x1xf32>
    %22 = arith.mulf %16, %16 : vector<16x1xf32>
    %23 = arith.subf %21, %22 : vector<16x1xf32>
    %cst_15 = arith.constant 0.000000e+00 : f32
    %24 = vector.broadcast %cst_15 : f32 to vector<16x1xf32>
    %25 = arith.maximumf %23, %24 : vector<16x1xf32>
    %cst_16 = arith.constant 9.99999974E-6 : f32
    %26 = vector.broadcast %cst_16 : f32 to vector<16x1xf32>
    %27 = arith.addf %25, %26 : vector<16x1xf32>
    %28 = math.rsqrt %27 : vector<16x1xf32>
    %29 = vector.broadcast %16 : vector<16x1xf32> to vector<16x128xf32>
    %30 = arith.subf %1, %29 : vector<16x128xf32>
    %31 = vector.broadcast %28 : vector<16x1xf32> to vector<16x128xf32>
    %32 = arith.mulf %30, %31 : vector<16x128xf32>
    %33 = vector.broadcast %10 : vector<1x128xf32> to vector<16x128xf32>
    %34 = arith.mulf %32, %33 : vector<16x128xf32>
    %35 = vector.broadcast %12 : vector<1x128xf32> to vector<16x128xf32>
    %36 = arith.addf %34, %35 : vector<16x128xf32>
    %c0_17 = arith.constant 0 : index
    %c0_18 = arith.constant 0 : index
    %c0_19 = arith.constant 0 : index
    %37 = vector.load %arg6[%c0_17, %c0_18, %c0_19] : memref<1x16x128xf32, #tpu.memory_space<vmem>>, vector<1x16x128xf32>
    %38 = vector.shape_cast %37 : vector<1x16x128xf32> to vector<16x128xf32>
    %39 = vector.shape_cast %36 : vector<16x128xf32> to vector<1x16x128xf32>
    tpu.vector_store %arg6[%c0_17, %c0_18, %c0_19], %39 {strides = array<i32>} : memref<1x16x128xf32, #tpu.memory_space<vmem>>, vector<1x16x128xf32>,
    return
  }
  func.func @transform_0(%arg0: i32, %arg1: i32) -> (i32, i32, i32) {
    %c0_i32 = arith.constant 0 : i32
    %c0_i32_0 = arith.constant 0 : i32
    return %arg0, %arg1, %c0_i32 : i32, i32, i32
  }
  func.func @transform_1(%arg0: i32, %arg1: i32) -> (i32, i32, i32) {
    %c0_i32 = arith.constant 0 : i32
    %c0_i32_0 = arith.constant 0 : i32
    %c0_i32_1 = arith.constant 0 : i32
    return %arg0, %c0_i32, %c0_i32_0 : i32, i32, i32
  }
  func.func @transform_2(%arg0: i32, %arg1: i32) -> (i32, i32) {
    %c0_i32 = arith.constant 0 : i32
    %c0_i32_0 = arith.constant 0 : i32
    %c0_i32_1 = arith.constant 0 : i32
    return %c0_i32, %c0_i32_0 : i32, i32
  }
  func.func @transform_3(%arg0: i32, %arg1: i32) -> (i32, i32) {
    %c0_i32 = arith.constant 0 : i32
    %c0_i32_0 = arith.constant 0 : i32
    %c0_i32_1 = arith.constant 0 : i32
    return %c0_i32, %c0_i32_0 : i32, i32
  }
  func.func @transform_4(%arg0: i32, %arg1: i32) -> (i32, i32, i32) {
    %c0_i32 = arith.constant 0 : i32
    %c0_i32_0 = arith.constant 0 : i32
    return %arg0, %arg1, %c0_i32 : i32, i32, i32
  }
}

</mosaic_0001>

<bundles_post_ra>
// kernel: tpu_custom_call.1
= control target key start
LH: loop header
LB: loop body
LE: loop exit
PB: predicated region body
PF: predicated region fallthrough
CT: control target
= control target key end

     0   :  { %9 = vsyncpa [#allocation3], 0  ;;  %s961_s0 = inlined_call_operand.hbm [shape: f32[2,16,128], index: 0, kind: input, shape index: {}]   ;;  %s962_s1 = inlined_call_operand.hbm [shape: f32[2,2,128], index: 1, kind: input, shape index: {}]   ;;  %s963_s2 = inlined_call_operand.vmem [shape: f32[1,128], index: 2, kind: input, shape index: {}]   ;;  %s964_s3 = inlined_call_operand.vmem [shape: f32[1,128], index: 3, kind: input, shape index: {}]   ;;  %s965_s4 = inlined_call_operand.hbm [shape: f32[2,16,128], index: 4, kind: output, shape index: {}]  }
   0x1   :  { %11 = vsyncpa [#allocation3 + $0x1], 0 }
   0x2   :  { %12 = vsyncpa [#allocation6], 0 }
   0x3   :  { %14 = vsyncpa [#allocation6 + $0x1], 0 }
   0x4   :  { %15 = vsyncpa [#allocation4], 0 }
   0x5   :  { %17 = vsyncpa [#allocation4 + $0x1], 0  ;;  %s730_s15 = smov 0   ;;  %s732_s16 = smov 0  }
   0x6   :  { %s734_s17 = smov 0   ;;  %s736_s18 = smov 0  }
   0x7   :  { %s738_s19 = smov 0   ;;  %s740_s20 = smov 0  }
   0x8 LB: > { %s455_s21 = sadd.s32 4294967295, %s696_s20   ;;  %s456_s22 = sadd.s32 4294967294, %s696_s20   ;;  %s696_s20 = sphi %s740_s20, %s23_s20   ;;  %s692_s19 = sphi %s738_s19, %s984_s19   ;;  %s688_s18 = sphi %s736_s18, %s983_s18   ;;  %s684_s17 = sphi %s734_s17, %s982_s17   ;;  %s680_s16 = sphi %s732_s16, %s981_s16   ;;  %s676_s15 = sphi %s730_s15, %s980_s15  }
   0x9   : > { %s35_s23 = sadd.s32 1, %s692_s19  ;;  %s44_s24 = sadd.s32 1, %s684_s17 }
   0xa   : > { %p37_p0 = scmp.ge.s32.totalorder %s35_s23, 2  ;;  %p51_p1 = scmp.ne.s32.totalorder %s684_s17, %s680_s16 }
   0xb   : > { %p52_p2 = scmp.eq.s32.totalorder %s696_s20, 0  ;;  %p57_p3 = scmp.ne.s32.totalorder %s680_s16, %s676_s15 }
   0xc   : > { %s986_s23 = smov (%p37_p0, %s35_s23), 0  ;;  %p58_p5 = scmp.eq.s32.totalorder %s455_s21, 0 }
   0xd   : > { %p771_p4 = por %p52_p2, %p51_p1  ;;  %s39_s26 = ssub.s32 %s692_s19, %s986_s23 }
   0xe   : > { %p151_p6 = scmp.eq.s32.totalorder %s455_s21, 1  ;;  %p42_p7 = scmp.eq.s32.totalorder %s39_s26, 0 }
   0xf   : > { %p777_p8 = por %p58_p5, %p57_p3  ;;  %p157_p10 = scmp.eq.s32.totalorder %s456_s22, 1 }
  0x10   : > { %p781_p9 = por %p151_p6, %p51_p1  ;;  %p492_p13 = scmp.lt.s32.totalorder %s696_s20, 2 }
  0x11   : > { %s969_s27 = scalar_select %p777_p8, 1, 0 }
  0x12   : > { %s970_s28 = scalar_select %p781_p9, 1, 0 }
  0x13   : > { %s786_s29 = scalar_select %p42_p7, %s684_s17, %s44_s24  }
  0x14   : > { %p788_p11 = por %p157_p10, %p57_p3  ;;  %s795_s5 = sand.u32 1, %s684_s17  }
  0x15   : > { %s459_s6 = sshll.u32 %s795_s5, 4  ;;  %s473_s7 = sshll.u32 %s692_s19, 8 }
  0x16   : > { %s971_s30 = scalar_select %p788_p11, 1, 0 }
  0x17   : > { %s802_s10 = scalar_lea.hbm %s961_s0, %s473_s7  ;;  %s187_s11 = scalar_lea.vmem [#allocation2], %s459_s6 }
  0x18   : > { %s196_s12 = sshll.u32 %s187_s11, 4  ;;  %p808_p0 = pnand %p492_p13, %p771_p4  ;;  %s804_s12 = int_to_ptr.vmem [resolvable:$true] %s196_s12 }
  0x19   : > { %s184_s14 = scalar_lea.sflag [#allocation3], %s795_s5  ;;  %s550_s21 = scalar_lea.hbm %s802_s10, 256 }
  0x1a   : > { %p551_p2 = scmp.ne.s32.totalorder %s802_s10, %s550_s21  ;;  %p552_p3 = pneg %p808_p0 }
  0x1b   : > { %s555_s25 = scalar_lea.hbm %s961_s0, 512  ;;  %p556_p4 = scmp.lt.u32.totalorder %s802_s10, %s961_s0 }
  0x1c   : > { %p553_p5 = pnand %p552_p3, %p551_p2  ;;  %p557_p7 = scmp.lt.u32.totalorder %s555_s25, %s550_s21 }
  0x1d   : > { %p559_p13 = scmp.lt.u32.totalorder %s550_s21, %s802_s10 }
  0x1e   : > { %p554_p6 = pneg %p553_p5  ;;  %p558_p10 = por %p557_p7, %p556_p4 }
  0x20   : > { %p560_p12 = por %p559_p13, %p558_p10 }
  0x22   : > { %p561_p1 = pnand %p560_p12, %p554_p6 }
  0x24   : > { %564 = shalt.err (!%p561_p1)
}
  0x25   : > { %s565_s7 = scalar_lea.vmem %s804_s12, 256  ;;  %s698_s8 = smov [#allocation2]  }
  0x26   : > { %p566_p2 = scmp.ne.s32.totalorder %s804_s12, %s565_s7  ;;  %s570_s9 = sshll.u32 %s698_s8, 4  ;;  %s571_s9 = int_to_ptr.vmem [resolvable:$false] %s570_s9 }
  0x27   : > { %s572_s11 = scalar_lea.vmem %s571_s9, 512  ;;  %p573_p9 = scmp.lt.s32.totalorder %s804_s12, %s571_s9 }
  0x28   : > { %p568_p5 = pnand %p566_p2, %p552_p3  ;;  %p574_p4 = scmp.lt.s32.totalorder %s572_s11, %s565_s7 }
  0x2a   : > { %p569_p11 = pneg %p568_p5  ;;  %p575_p7 = por %p574_p4, %p573_p9 }
  0x2c   : > { %p576_p10 = pnand %p575_p7, %p569_p11 }
  0x2e   : > { %579 = shalt.err (!%p576_p10)
}
  0x2f   : > { %s699_s21 = smov 128   ;;  %s700_s22 = smov 8  }
  0x30   : > { %484 = dma.hbm_to_vmem [thread:$0]  (!%p808_p0), %s802_s10, 256, %s804_s12, %s184_s14, %s699_s21, %s699_s21, %s700_s22  }
  0x31   : > { %p222_p12 = scmp.lt.s32.totalorder %s696_s20, 3  ;;  %s462_s24 = sshll.u32 %s795_s5, 1 }
  0x32   : > { %s463_s25 = sshll.u32 %s692_s19, 5  ;;  %p973_p9 = scmp.ge.s32.totalorder %s696_s20, 1 }
  0x33   : > { %s853_s8 = scalar_lea.hbm %s962_s1, %s463_s25  ;;  %s210_s9 = scalar_lea.vmem [#allocation5], %s462_s24 }
  0x34   : > { %p846_p11 = pnand %p973_p9, %p222_p12  ;;  %s217_s11 = sshll.u32 %s210_s9, 4  ;;  %s218_s11 = int_to_ptr.vmem [resolvable:$true] %s217_s11 }
  0x35   : > { %s207_s10 = scalar_lea.sflag [#allocation6], %s795_s5  ;;  %s580_s12 = scalar_lea.hbm %s853_s8, 32 }
  0x36   : > { %s974_s26 = scalar_select %p846_p11, 1, 0 }
  0x37   : > { %p581_p1 = scmp.ne.s32.totalorder %s853_s8, %s580_s12  ;;  %s585_s22 = scalar_lea.hbm %s962_s1, 64 }
  0x38   : > { %p586_p2 = scmp.lt.u32.totalorder %s853_s8, %s962_s1  ;;  %p587_p5 = scmp.lt.u32.totalorder %s585_s22, %s580_s12 }
  0x39   : > { %p583_p6 = pnand %p581_p1, %p552_p3  ;;  %p589_p7 = scmp.lt.u32.totalorder %s580_s12, %s853_s8 }
  0x3a   : > { %p588_p4 = por %p587_p5, %p586_p2 }
  0x3b   : > { %p584_p13 = pneg %p583_p6 }
  0x3c   : > { %p590_p10 = por %p589_p7, %p588_p4 }
  0x3e   : > { %p591_p12 = pnand %p590_p10, %p584_p13 }
  0x40   : > { %594 = shalt.err (!%p591_p12)
}
  0x41   : > { %s595_s5 = scalar_lea.vmem %s218_s11, 32  ;;  %s701_s24 = smov [#allocation5]  }
  0x42   : > { %p596_p9 = scmp.ne.s32.totalorder %s218_s11, %s595_s5  ;;  %s600_s7 = sshll.u32 %s701_s24, 4  ;;  %s601_s7 = int_to_ptr.vmem [resolvable:$false] %s600_s7 }
  0x43   : > { %s602_s9 = scalar_lea.vmem %s601_s7, 64  ;;  %p603_p8 = scmp.lt.s32.totalorder %s218_s11, %s601_s7 }
  0x44   : > { %p598_p1 = pnand %p596_p9, %p552_p3  ;;  %p604_p11 = scmp.lt.s32.totalorder %s602_s9, %s595_s5 }
  0x46   : > { %p599_p6 = pneg %p598_p1  ;;  %p605_p2 = por %p604_p11, %p603_p8 }
  0x48   : > { %p606_p5 = pnand %p605_p2, %p599_p6 }
  0x4a   : > { %609 = shalt.err (!%p606_p5)
}
  0x4b   : > { %487 = dma.hbm_to_vmem [thread:$0]  (!%p808_p0), %s853_s8, 32, %s218_s11, %s207_s10  }
  0x4c   : > { %p975_p13 = scmp.ne.s32.totalorder %s974_s26, 0 }
  0x4d   : > { %s878_s12 = sand.u32 (!%p975_p13), 1, %s680_s16   ;;  %p976_p8 = scmp.ne.s32.totalorder (!%p975_p13), %s969_s27, 0 }
  0x4e   : > { %226 = sbr.rel (%p975_p13) target bundleno = 278 (0x116), region = 36  ;;  %s465_s14 = sshll.u32 (!%p975_p13), %s878_s12, 4 }
  0x4f   : > { %s229_s21 = scalar_lea.sflag (!%p975_p13), [#allocation3], %s878_s12  ;;  %s232_s22 = scalar_lea.vmem (!%p975_p13), [#allocation2], %s465_s14 }
  0x55   : > { %663 = dma.done.wait (%p976_p8), %s229_s21, 256  }
  0x56   : > { %665 = vsyncadd (%p976_p8), %s229_s21, 4294967040  ;;  %s466_s13 = sshll.u32 %s878_s12, 1  ;;  %s238_s26 = scalar_lea.sflag [#allocation6], %s878_s12 }
  0x57   : > { %s890_s8 = scalar_lea.vmem [#allocation5], %s466_s13 }
  0x58   : > { %667 = dma.done.wait (%p976_p8), %s238_s26, 32  }
  0x59   : > { %669 = vsyncadd (%p976_p8), %s238_s26, 4294967264  ;;  %v273_v0 = vld [vmem:[%s232_s22] sm:$0xff]  ;;  %v274_v1 = vld [vmem:[%s232_s22 + $0x8] sm:$0xff]  ;;  %v312_v17 = vlaneseq  ;;  %s474_s6 = sshll.u32 %s688_s18, 8  ;;  %s270_s5 = scalar_lea.vmem [#allocation7], %s465_s14 }
  0x5a   : > { %283 = vadd.xlane.f32.xlu0 %v273_v0  ;;  %v289_v2 = vmul.f32 %v273_v0, %v273_v0  ;;  %v290_v3 = vmul.f32 %v274_v1, %v274_v1  ;;  %v276_v13 = vld [vmem:[%s890_s8 + $0x1] sm:$0x1]  ;;  %v278_v21 = vld [vmem:[%s964_s3] sm:$0x1]  ;;  %s345_s24 = sshll.u32 %s270_s5, 4  ;;  %s910_s21 = scalar_lea.hbm %s965_s4, %s474_s6  ;;  %s912_s24 = int_to_ptr.vmem [resolvable:$true] %s345_s24 }
  0x5b   : > { %v279_v20 = vadd.f32 1.0, %v276_v13  ;;  %v313_v23 = vshrl.u32 %v312_v17, 7  ;;  %v277_v24 = vld [vmem:[%s963_s2] sm:$0x1]  ;;  %s330_s22 = scalar_lea.sflag [#allocation4], %s878_s12  ;;  %s610_s13 = scalar_lea.vmem %s912_s24, 256 }
  0x5c   : > { %291 = vadd.xlane.f32.xlu1 %v289_v2  ;;  %v275_v27 = vld [vmem:[%s890_s8] sm:$0x1]  ;;  %p611_p0 = scmp.ne.s32.totalorder %s912_s24, %s610_s13  ;;  %p977_p3 = scmp.ne.s32.totalorder %s970_s28, 0 }
  0x5d   : > { %v281_v26 = vmul.f32 %v279_v20, %v278_v21  ;;  %v280_v28 = vmul.f32 %v279_v20, %v277_v24  ;;  %v314_v29 = vsub.s32 0, %v313_v23  ;;  %s702_s18 = smov [#allocation7]  }
  0x5e   : > { %285 = vadd.xlane.f32.xlu0 %v274_v1  ;;  %p612_p11 = pnand %p611_p0, %p977_p3  ;;  %s614_s14 = sshll.u32 %s702_s18, 4  ;;  %s615_s14 = int_to_ptr.vmem [resolvable:$false] %s614_s14 }
  0x5f   : > { %v282_v30 = vadd.f32 %v281_v26, %v275_v27  ;;  %v315_v32 = vrot.slane %v280_v28, %v314_v29  ;;  %s616_s26 = scalar_lea.vmem %s615_s14, 512  ;;  %p617_p7 = scmp.lt.s32.totalorder %s912_s24, %s615_s14 }
  0x60   : > { %293 = vadd.xlane.f32.xlu1 %v290_v3  ;;  %p613_p4 = pneg %p612_p11  ;;  %p618_p10 = scmp.lt.s32.totalorder %s616_s26, %s610_s13 }
  0x61   : > { %v323_v34 = vrot.slane %v282_v30, %v314_v29 }
  0x62   : > { %p619_p12 = por %p618_p10, %p617_p7 }
  0x64   : > { %p620_p9 = pnand %p619_p12, %p613_p4 }
  0xe7   : > { %v284_v4 = vpop.xlane.xlu0 %283 }
  0xe8   : > { %v287_v5 = vmul.f32 0.0078125, %v284_v4 }
  0xe9   : > { %v292_v6 = vpop.xlane.xlu1 %291 }
  0xea   : > { %v297_v7 = vmul.f32 %v287_v5, %v287_v5  ;;  %v295_v8 = vmul.f32 0.0078125, %v292_v6  ;;  %v307_v31 = vsub.f32 %v273_v0, %v287_v5 }
  0xeb   : > { %v286_v9 = vpop.xlane.xlu0 %285 }
  0xec   : > { %v299_v10 = vsub.f32 %v295_v8, %v297_v7  ;;  %v288_v11 = vmul.f32 0.0078125, %v286_v9 }
  0xed   : > { %v294_v12 = vpop.xlane.xlu1 %293 }
  0xee   : > { %v301_v14 = vmax.f32 %v299_v10, 0.0  ;;  %v298_v15 = vmul.f32 %v288_v11, %v288_v11  ;;  %v296_v16 = vmul.f32 0.0078125, %v294_v12  ;;  %v308_v37 = vsub.f32 %v274_v1, %v288_v11 }
  0xf0   : > { %v303_v18 = vadd.f32 1e-05, %v301_v14  ;;  %v300_v19 = vsub.f32 %v296_v16, %v298_v15 }
  0xf2   : > { %546 = vrsqrt.f32 %v303_v18  ;;  %v302_v22 = vmax.f32 %v300_v19, 0.0 }
  0xf4   : > { %v304_v25 = vadd.f32 1e-05, %v302_v22 }
  0xf6   : > { %548 = vrsqrt.f32 %v304_v25 }
  0xfc   : > { %v547_v33 = vpop.eup %546 }
  0xfd   : > { %v309_v35 = vmul.f32 %v547_v33, %v307_v31 }
  0xff   : > { %v317_v36 = vmul.f32 %v315_v32, %v309_v35 }
 0x100   : > { %v549_v38 = vpop.eup %548 }
 0x101   : > { %v325_v39 = vadd.f32 %v323_v34, %v317_v36  ;;  %v310_v40 = vmul.f32 %v549_v38, %v308_v37 }
 0x103   : > { %v318_v41 = vmul.f32 %v315_v32, %v310_v40  ;;  %327 = vst [vmem:[%s270_s5] sm:$0xff] %v325_v39 }
 0x105   : > { %v326_v42 = vadd.f32 %v323_v34, %v318_v41 }
 0x107   : > { %328 = vst [vmem:[%s270_s5 + $0x8] sm:$0xff] %v326_v42 }
 0x108   : > { %623 = shalt.err (!%p620_p9)
}
 0x109   : > { %s624_s8 = scalar_lea.hbm %s910_s21, 256  ;;  %s628_s10 = scalar_lea.hbm %s965_s4, 512 }
 0x10a   : > { %p625_p1 = scmp.ne.s32.totalorder %s910_s21, %s624_s8  ;;  %p629_p5 = scmp.lt.u32.totalorder %s910_s21, %s965_s4 }
 0x10b   : > { %p630_p13 = scmp.lt.u32.totalorder %s628_s10, %s624_s8  ;;  %p632_p0 = scmp.lt.u32.totalorder %s624_s8, %s910_s21 }
 0x10c   : > { %p626_p6 = pnand %p625_p1, %p977_p3 }
 0x10d   : > { %p631_p8 = por %p630_p13, %p629_p5 }
 0x10e   : > { %p627_p2 = pneg %p626_p6 }
 0x10f   : > { %p633_p11 = por %p632_p0, %p631_p8 }
 0x111   : > { %p634_p4 = pnand %p633_p11, %p627_p2 }
 0x113   : > { %637 = shalt.err (!%p634_p4)
}
 0x114   : > { %s703_s5 = smov 128   ;;  %s704_s7 = smov 8  }
 0x115   : > { %479 = dma.vmem_to_hbm [thread:$0]  (%p977_p3), %s912_s24, 256, %s910_s21, %s330_s22, %s703_s5, %s703_s5, %s704_s7  }
 0x116 PF: > { %s360_s9 = sand.u32 1, %s676_s15   ;;  %p978_p7 = scmp.ne.s32.totalorder %s971_s30, 0 }
 0x117   : > { %p979_p10 = scmp.ge.s32.totalorder %s696_s20, 2  ;;  %s361_s13 = scalar_lea.sflag [#allocation4], %s360_s9 }
 0x119   : > { %p489_p12 = pnand %p979_p10, %p978_p7 }
 0x11b   : > { %671 = dma.done.wait (!%p489_p12), %s361_s13, 256  }
 0x11c   : > { %673 = vsyncadd (!%p489_p12), %s361_s13, 4294967040  ;;  %s23_s20 = sadd.s32 1, %s696_s20   ;;  %s980_s15 = smov %s680_s16 }
 0x11d   : > { %p20_p9 = scmp.ge.s32.totalorder %s23_s20, 4   ;;  %s981_s16 = smov %s684_s17 }
 0x11e   : > { %s982_s17 = smov %s786_s29  ;;  %s983_s18 = smov %s692_s19 }
 0x11f   : > { %s984_s19 = smov %s986_s23  ;;  %22 = sbr.rel (!%p20_p9) target bundleno = 8 (0x8), region = 94 }
 0x126   :  { %366 = vsyncpa [#allocation3], 1 }
 0x127   :  { %368 = vsyncpa [#allocation3 + $0x1], 1 }
 0x128   :  { %369 = vsyncpa [#allocation6], 1 }
 0x129   :  { %371 = vsyncpa [#allocation6 + $0x1], 1 }
 0x12a   :  { %372 = vsyncpa [#allocation4], 1 }
 0x12b   :  { %374 = vsyncpa [#allocation4 + $0x1], 1 }

</bundles_post_ra>
